<compile_context>
chip_gen: v5e
topology: v5e:2x2
jax: 0.10.0
libtpu: 0.0.40
codegen_flags: <defaults>
</compile_context>

<pallas_src>
import functools

import jax
import jax.numpy as jnp
import numpy as np
from jax import lax
from jax.experimental import pallas as pl
from jax.experimental.pallas import tpu as pltpu


# --------------------------------- kernel ------------------------------------

def _tran_bloc_kernel(x_ref, masks_ref, ones_ref, w1_ref, w2_ref, wc_ref, bc_ref,
                      o_ref, *, W, C, Mmax):
    C2 = 2 * C
    xf = x_ref[...]                       # (2C, L): rows [0:C]=main copy, [C:2C]=att copy
    L = xf.shape[-1]
    bias_blk = ones_ref[...]              # (8, L): row 0 = ones (bias folded into matmul)

    # Trace-time tap shift amounts: output p reads input (p + dy*W + dx) mod L.
    # pltpu.roll follows np.roll semantics (y[p] = x[(p - shift) mod L]).
    taps = []
    for dy in (-1, 0, 1):
        for dx in (-1, 0, 1):
            taps.append(((dy, dx), (-(dy * W + dx)) % L))

    def conv3x3(t, w_packed):
        # im2col: 9 rolled taps of the stacked (2C, L) tensor -> 8-row-aligned
        # slabs; non-center taps masked (one full-vreg multiply each, center
        # skipped); plus an 8-row bias block.  One (2C, 80) x (80, L) matmul.
        slabs = []
        for i, ((dy, dx), s) in enumerate(taps):
            if (dy, dx) == (0, 0):
                slabs.append(t)                                  # no roll, no mask
            else:
                slabs.append(pltpu.roll(t, s, axis=1) * masks_ref[i])
        slabs.append(bias_blk)
        col = jnp.concatenate(slabs, axis=0)                     # (9*2C+8, L)
        return jnp.dot(w_packed, col, preferred_element_type=jnp.float32)

    def resblock(t, w1, w2):
        return t + conv3x3(jnp.maximum(conv3x3(t, w1), 0.0), w2)

    # Fused resblock chain over both branches (block-diagonal packed weights).
    if Mmax <= 4:
        # Short fixed depth: unroll for LLO scheduler visibility.
        t = xf
        for i in range(Mmax):
            t = resblock(t, w1_ref[i], w2_ref[i])
    else:
        # Deeper stacks: fori_loop keeps vreg pressure / code size flat.
        t = lax.fori_loop(
            0, Mmax, lambda i, tt: resblock(tt, w1_ref[i], w2_ref[i]), xf)

    mainp = t[0:C, :]
    # 1x1 conv on the attention half: (C, C) x (C, L) + bias.
    attc = jnp.dot(wc_ref[...], t[C:C2, :],
                   preferred_element_type=jnp.float32) + bc_ref[...]
    o_ref[...] = mainp * jax.nn.sigmoid(attc) + xf[0:C, :]


# ------------------------------ weight packing --------------------------------

def _pack_branch_weights(wm, bm, wa, ba, Mmax):
    """Block-diagonal im2col weights for the stacked (main ‖ att) branches.

    Returns (Mmax, 2C, 9*2C + 8), tap-major ((ky,kx) row-major, cin fastest):
      columns [k*2C : k*2C+C]     = main-branch weights of tap k (zero for i >= M1)
      columns [k*2C+C : (k+1)*2C] = att-branch  weights of tap k (zero for i >= M2)
      column  9*2C                = bias (pairs with the ones row of the col)
      columns 9*2C+1 .. 9*2C+7    = zero padding (keeps K a multiple of 8)
    Zero off-diagonal blocks => no cross-talk between branches; zero weights
    AND bias beyond a branch's depth make that resblock an exact identity,
    which handles M1 != M2.
    """
    M1, C = wm.shape[0], wm.shape[1]
    M2 = wa.shape[0]
    C2 = 2 * C

    def pad_depth(a, M):
        return jnp.pad(a, [(0, Mmax - M)] + [(0, 0)] * (a.ndim - 1))

    wm, bm = pad_depth(wm, M1), pad_depth(bm, M1)
    wa, ba = pad_depth(wa, M2), pad_depth(ba, M2)

    z = jnp.zeros((Mmax, C, C, 3, 3), wm.dtype)
    wbd = jnp.concatenate([jnp.concatenate([wm, z], axis=2),
                           jnp.concatenate([z, wa], axis=2)],
                          axis=1)                                  # (Mmax,2C,2C,3,3)
    # (i, out, in, ky, kx) -> (i, out, ky, kx, in) -> (i, 2C, 9*2C)
    wflat = jnp.transpose(wbd, (0, 1, 3, 4, 2)).reshape(Mmax, C2, 9 * C2)
    bias = jnp.concatenate([bm, ba], axis=1)[..., None]            # (Mmax, 2C, 1)
    pad = jnp.zeros((Mmax, C2, 7), wm.dtype)
    return jnp.concatenate([wflat, bias, pad], axis=2)             # (Mmax, 2C, 9*2C+8)


# --------------------------------- wrapper -----------------------------------

def _single_tensorcore_device() -> bool:
    """True for single-TC chips (v5e/v6e) where the per-batch grid is pure overhead."""
    try:
        kind = jax.devices()[0].device_kind.lower()
    except Exception:
        return False
    return ("lite" in kind) or ("v5e" in kind) or ("v6e" in kind)


def tran_bloc_forward(x_nchw, params, *, M1, M2, merge_batch=None):
    B, C, H, W = x_nchw.shape
    HW = H * W
    C2 = 2 * C
    Mmax = max(M1, M2)

    if merge_batch is None:
        merge_batch = _single_tensorcore_device()

    # -- packed weights (block-diagonal, bias column folded in) --
    w1 = _pack_branch_weights(params["wm1"], params["bm1"],
                              params["wa1"], params["ba1"], Mmax)
    w2 = _pack_branch_weights(params["wm2"], params["bm2"],
                              params["wa2"], params["ba2"], Mmax)
    wc = params["wc"][:, :, 0, 0]              # (C, C)
    bc = params["bc"][:, None]                 # (C, 1)

    # -- input layout --
    x_flat = x_nchw.reshape(B, C, HW)
    if merge_batch:
        # single-TC: batch merged onto lanes, one grid step
        G, L = 1, B * HW
        xs = jnp.transpose(x_flat, (1, 0, 2)).reshape(1, C, L)     # (1, C, B*HW)
    else:
        # multi-TC (v7x / megacore): one image per grid step, "parallel"
        G, L = B, HW
        xs = x_flat                                                # (B, C, HW)
    x_stacked = jnp.concatenate([xs, xs], axis=1)                  # (G, 2C, L)

    # -- zero-padding masks for the 8 non-center taps (depend only on H, W);
    #    pre-broadcast to (9, 2C, L) host-side, tiled per image when merged --
    p = np.arange(HW)
    hh, ww = p // W, p % W
    mlist = []
    for dy in (-1, 0, 1):
        for dx in (-1, 0, 1):
            mlist.append(((hh + dy >= 0) & (hh + dy < H) &
                          (ww + dx >= 0) & (ww + dx < W)).astype(np.float32))
    m = np.stack(mlist)                                            # (9, HW)
    if merge_batch:
        m = np.tile(m, (1, B))                                     # (9, B*HW)
    masks = jnp.asarray(np.broadcast_to(m[:, None, :], (9, C2, L)).copy())

    # -- constant bias-row block: row 0 ones, rows 1..7 zeros (keeps K 8-aligned) --
    ones_blk = jnp.asarray(np.concatenate([np.ones((1, L), np.float32),
                                           np.zeros((7, L), np.float32)], axis=0))

    kernel = functools.partial(_tran_bloc_kernel, W=W, C=C, Mmax=Mmax)

    def full_spec(a):
        nd = a.ndim
        return pl.BlockSpec(a.shape, lambda g, nd=nd: (0,) * nd)

    consts = (masks, ones_blk, w1, w2, wc, bc)

    out = pl.pallas_call(
        kernel,
        out_shape=jax.ShapeDtypeStruct((G, C, L), jnp.float32),
        grid_spec=pltpu.PrefetchScalarGridSpec(
            num_scalar_prefetch=0,
            grid=(G,),
            in_specs=[pl.BlockSpec((None, C2, L), lambda g: (g, 0, 0))]
                     + [full_spec(a) for a in consts],
            out_specs=pl.BlockSpec((None, C, L), lambda g: (g, 0, 0)),
        ),
        compiler_params=pltpu.CompilerParams(dimension_semantics=("parallel",)),
    )(x_stacked, *consts)

    if merge_batch:
        out = jnp.transpose(out.reshape(C, B, HW), (1, 0, 2))      # (B, C, HW)
    return out.reshape(B, C, H, W)


# ------------------------------ pure-JAX reference ----------------------------

def _conv_ref(x, w, b, pad):
    y = lax.conv_general_dilated(x, w, (1, 1), [(pad, pad), (pad, pad)],
                                 dimension_numbers=("NCHW", "OIHW", "NCHW"))
    return y + b[None, :, None, None]


def tran_bloc_ref(x, p, M1, M2):
    def resblock(t, w1, b1, w2, b2):
        return t + _conv_ref(jax.nn.relu(_conv_ref(t, w1, b1, 1)), w2, b2, 1)

    main = x
    for i in range(M1):
        main = resblock(main, p["wm1"][i], p["bm1"][i], p["wm2"][i], p["bm2"][i])
    att = x
    for i in range(M2):
        att = resblock(att, p["wa1"][i], p["ba1"][i], p["wa2"][i], p["ba2"][i])
    att = _conv_ref(att, p["wc"], p["bc"], 0)
    return main * jax.nn.sigmoid(att) + x


# ----------------------------------- main -------------------------------------

if __name__ == "__main__":
    B, N, H, W = 2, 4, 16, 16
    M1, M2 = 2, 2   # Tran_Bloc(in_channel=N, M1_block=M1, M2_block=M2, FLAG_NLB=True)

    key = jax.random.PRNGKey(0)
    ks = jax.random.split(key, 12)
    params = {
        "wm1": 0.1 * jax.random.normal(ks[0], (M1, N, N, 3, 3), jnp.float32),
        "bm1": 0.1 * jax.random.normal(ks[1], (M1, N), jnp.float32),
        "wm2": 0.1 * jax.random.normal(ks[2], (M1, N, N, 3, 3), jnp.float32),
        "bm2": 0.1 * jax.random.normal(ks[3], (M1, N), jnp.float32),
        "wa1": 0.1 * jax.random.normal(ks[4], (M2, N, N, 3, 3), jnp.float32),
        "ba1": 0.1 * jax.random.normal(ks[5], (M2, N), jnp.float32),
        "wa2": 0.1 * jax.random.normal(ks[6], (M2, N, N, 3, 3), jnp.float32),
        "ba2": 0.1 * jax.random.normal(ks[7], (M2, N), jnp.float32),
        "wc": 0.1 * jax.random.normal(ks[8], (N, N, 1, 1), jnp.float32),
        "bc": 0.1 * jax.random.normal(ks[9], (N,), jnp.float32),
    }
    x = 0.5 * jax.random.normal(ks[10], (B, N, H, W), jnp.float32)

    fwd = jax.jit(functools.partial(tran_bloc_forward, M1=M1, M2=M2))
    out = jax.block_until_ready(fwd(x, params))

    ref = jax.block_until_ready(tran_bloc_ref(x, params, M1, M2))
    np.testing.assert_allclose(np.asarray(out), np.asarray(ref),
                               rtol=1e-4, atol=1e-4)
    print("KERNEL_OK")
</pallas_src>

<mosaic_0001>
module attributes {stable_mosaic.version = 11 : i64} {
  func.func @_tran_bloc_kernel(%arg0: i32, %arg1: memref<1x8x256xf32, #tpu.memory_space<vmem>>, %arg2: memref<9x8x256xf32, #tpu.memory_space<vmem>>, %arg3: memref<8x256xf32, #tpu.memory_space<vmem>>, %arg4: memref<2x8x80xf32, #tpu.memory_space<vmem>>, %arg5: memref<2x8x80xf32, #tpu.memory_space<vmem>>, %arg6: memref<4x4xf32, #tpu.memory_space<vmem>>, %arg7: memref<4x1xf32, #tpu.memory_space<vmem>>, %arg8: memref<1x4x256xf32, #tpu.memory_space<vmem>>) attributes {dimension_semantics = [#tpu.dimension_semantics<parallel>], iteration_bounds = array<i64: 2>, scalar_prefetch = 0 : i64, scratch_operands = 0 : i64, tpu.core_type = #tpu.core_type<tc>, window_params = [{transform_indices = @transform_0, window_bounds = array<i64: 1, 8, 256>}, {pipeline_mode = #tpu.pipeline_mode<synchronous>, transform_indices = @transform_1, window_bounds = array<i64: 9, 8, 256>}, {pipeline_mode = #tpu.pipeline_mode<synchronous>, transform_indices = @transform_2, window_bounds = array<i64: 8, 256>}, {pipeline_mode = #tpu.pipeline_mode<synchronous>, transform_indices = @transform_3, window_bounds = array<i64: 2, 8, 80>}, {pipeline_mode = #tpu.pipeline_mode<synchronous>, transform_indices = @transform_4, window_bounds = array<i64: 2, 8, 80>}, {pipeline_mode = #tpu.pipeline_mode<synchronous>, transform_indices = @transform_5, window_bounds = array<i64: 4, 4>}, {pipeline_mode = #tpu.pipeline_mode<synchronous>, transform_indices = @transform_6, window_bounds = array<i64: 4, 1>}, {transform_indices = @transform_7, window_bounds = array<i64: 1, 4, 256>}]} {
    %c0 = arith.constant 0 : index
    %c0_0 = arith.constant 0 : index
    %c0_1 = arith.constant 0 : index
    %0 = vector.load %arg1[%c0, %c0_0, %c0_1] : memref<1x8x256xf32, #tpu.memory_space<vmem>>, vector<1x8x256xf32>
    %1 = vector.shape_cast %0 : vector<1x8x256xf32> to vector<8x256xf32>
    %c0_2 = arith.constant 0 : index
    %c0_3 = arith.constant 0 : index
    %2 = vector.load %arg3[%c0_2, %c0_3] : memref<8x256xf32, #tpu.memory_space<vmem>>, vector<8x256xf32>
    %c0_4 = arith.constant 0 : index
    %c0_5 = arith.constant 0 : index
    %c0_6 = arith.constant 0 : index
    %3 = vector.load %arg4[%c0_4, %c0_5, %c0_6] : memref<2x8x80xf32, #tpu.memory_space<vmem>>, vector<1x8x80xf32>
    %4 = vector.shape_cast %3 : vector<1x8x80xf32> to vector<8x80xf32>
    %c0_7 = arith.constant 0 : index
    %c0_8 = arith.constant 0 : index
    %c0_9 = arith.constant 0 : index
    %5 = vector.load %arg5[%c0_7, %c0_8, %c0_9] : memref<2x8x80xf32, #tpu.memory_space<vmem>>, vector<1x8x80xf32>
    %6 = vector.shape_cast %5 : vector<1x8x80xf32> to vector<8x80xf32>
    %c17_i32 = arith.constant 17 : i32
    %7 = tpu.dynamic_rotate %1 by %c17_i32 dim 1 : vector<8x256xf32>, i32 -> vector<8x256xf32>
    %c0_10 = arith.constant 0 : index
    %c0_11 = arith.constant 0 : index
    %c0_12 = arith.constant 0 : index
    %8 = vector.load %arg2[%c0_10, %c0_11, %c0_12] : memref<9x8x256xf32, #tpu.memory_space<vmem>>, vector<1x8x256xf32>
    %9 = vector.shape_cast %8 : vector<1x8x256xf32> to vector<8x256xf32>
    %10 = arith.mulf %7, %9 : vector<8x256xf32>
    %c16_i32 = arith.constant 16 : i32
    %11 = tpu.dynamic_rotate %1 by %c16_i32 dim 1 : vector<8x256xf32>, i32 -> vector<8x256xf32>
    %c1 = arith.constant 1 : index
    %c0_13 = arith.constant 0 : index
    %c0_14 = arith.constant 0 : index
    %12 = vector.load %arg2[%c1, %c0_13, %c0_14] : memref<9x8x256xf32, #tpu.memory_space<vmem>>, vector<1x8x256xf32>
    %13 = vector.shape_cast %12 : vector<1x8x256xf32> to vector<8x256xf32>
    %14 = arith.mulf %11, %13 : vector<8x256xf32>
    %c15_i32 = arith.constant 15 : i32
    %15 = tpu.dynamic_rotate %1 by %c15_i32 dim 1 : vector<8x256xf32>, i32 -> vector<8x256xf32>
    %c2 = arith.constant 2 : index
    %c0_15 = arith.constant 0 : index
    %c0_16 = arith.constant 0 : index
    %16 = vector.load %arg2[%c2, %c0_15, %c0_16] : memref<9x8x256xf32, #tpu.memory_space<vmem>>, vector<1x8x256xf32>
    %17 = vector.shape_cast %16 : vector<1x8x256xf32> to vector<8x256xf32>
    %18 = arith.mulf %15, %17 : vector<8x256xf32>
    %c1_i32 = arith.constant 1 : i32
    %19 = tpu.dynamic_rotate %1 by %c1_i32 dim 1 : vector<8x256xf32>, i32 -> vector<8x256xf32>
    %c3 = arith.constant 3 : index
    %c0_17 = arith.constant 0 : index
    %c0_18 = arith.constant 0 : index
    %20 = vector.load %arg2[%c3, %c0_17, %c0_18] : memref<9x8x256xf32, #tpu.memory_space<vmem>>, vector<1x8x256xf32>
    %21 = vector.shape_cast %20 : vector<1x8x256xf32> to vector<8x256xf32>
    %22 = arith.mulf %19, %21 : vector<8x256xf32>
    %c255_i32 = arith.constant 255 : i32
    %23 = tpu.dynamic_rotate %1 by %c255_i32 dim 1 : vector<8x256xf32>, i32 -> vector<8x256xf32>
    %c5 = arith.constant 5 : index
    %c0_19 = arith.constant 0 : index
    %c0_20 = arith.constant 0 : index
    %24 = vector.load %arg2[%c5, %c0_19, %c0_20] : memref<9x8x256xf32, #tpu.memory_space<vmem>>, vector<1x8x256xf32>
    %25 = vector.shape_cast %24 : vector<1x8x256xf32> to vector<8x256xf32>
    %26 = arith.mulf %23, %25 : vector<8x256xf32>
    %c241_i32 = arith.constant 241 : i32
    %27 = tpu.dynamic_rotate %1 by %c241_i32 dim 1 : vector<8x256xf32>, i32 -> vector<8x256xf32>
    %c6 = arith.constant 6 : index
    %c0_21 = arith.constant 0 : index
    %c0_22 = arith.constant 0 : index
    %28 = vector.load %arg2[%c6, %c0_21, %c0_22] : memref<9x8x256xf32, #tpu.memory_space<vmem>>, vector<1x8x256xf32>
    %29 = vector.shape_cast %28 : vector<1x8x256xf32> to vector<8x256xf32>
    %30 = arith.mulf %27, %29 : vector<8x256xf32>
    %c240_i32 = arith.constant 240 : i32
    %31 = tpu.dynamic_rotate %1 by %c240_i32 dim 1 : vector<8x256xf32>, i32 -> vector<8x256xf32>
    %c7 = arith.constant 7 : index
    %c0_23 = arith.constant 0 : index
    %c0_24 = arith.constant 0 : index
    %32 = vector.load %arg2[%c7, %c0_23, %c0_24] : memref<9x8x256xf32, #tpu.memory_space<vmem>>, vector<1x8x256xf32>
    %33 = vector.shape_cast %32 : vector<1x8x256xf32> to vector<8x256xf32>
    %34 = arith.mulf %31, %33 : vector<8x256xf32>
    %c239_i32 = arith.constant 239 : i32
    %35 = tpu.dynamic_rotate %1 by %c239_i32 dim 1 : vector<8x256xf32>, i32 -> vector<8x256xf32>
    %c8 = arith.constant 8 : index
    %c0_25 = arith.constant 0 : index
    %c0_26 = arith.constant 0 : index
    %36 = vector.load %arg2[%c8, %c0_25, %c0_26] : memref<9x8x256xf32, #tpu.memory_space<vmem>>, vector<1x8x256xf32>
    %37 = vector.shape_cast %36 : vector<1x8x256xf32> to vector<8x256xf32>
    %38 = arith.mulf %35, %37 : vector<8x256xf32>
    %39 = tpu.concatenate %10, %14, %18, %22, %1, %26, %30, %34, %38, %2 in 0 : vector<8x256xf32>, vector<8x256xf32>, vector<8x256xf32>, vector<8x256xf32>, vector<8x256xf32>, vector<8x256xf32>, vector<8x256xf32>, vector<8x256xf32>, vector<8x256xf32>, vector<8x256xf32> -> vector<80x256xf32>
    %cst = arith.constant dense<0.000000e+00> : vector<8x256xf32>
    %40 = tpu.matmul %4, %39, %cst {dimension_numbers = #tpu.dot_dimension_numbers<[1], [0], [0], [1], [0, 0, 1, 1], [], []>} : vector<8x80xf32>, vector<80x256xf32>, vector<8x256xf32> -> vector<8x256xf32>
    %cst_27 = arith.constant 0.000000e+00 : f32
    %41 = vector.broadcast %cst_27 : f32 to vector<8x256xf32>
    %42 = arith.maximumf %40, %41 : vector<8x256xf32>
    %c17_i32_28 = arith.constant 17 : i32
    %43 = tpu.dynamic_rotate %42 by %c17_i32_28 dim 1 : vector<8x256xf32>, i32 -> vector<8x256xf32>
    %c0_29 = arith.constant 0 : index
    %c0_30 = arith.constant 0 : index
    %c0_31 = arith.constant 0 : index
    %44 = vector.load %arg2[%c0_29, %c0_30, %c0_31] : memref<9x8x256xf32, #tpu.memory_space<vmem>>, vector<1x8x256xf32>
    %45 = vector.shape_cast %44 : vector<1x8x256xf32> to vector<8x256xf32>
    %46 = arith.mulf %43, %45 : vector<8x256xf32>
    %c16_i32_32 = arith.constant 16 : i32
    %47 = tpu.dynamic_rotate %42 by %c16_i32_32 dim 1 : vector<8x256xf32>, i32 -> vector<8x256xf32>
    %c1_33 = arith.constant 1 : index
    %c0_34 = arith.constant 0 : index
    %c0_35 = arith.constant 0 : index
    %48 = vector.load %arg2[%c1_33, %c0_34, %c0_35] : memref<9x8x256xf32, #tpu.memory_space<vmem>>, vector<1x8x256xf32>
    %49 = vector.shape_cast %48 : vector<1x8x256xf32> to vector<8x256xf32>
    %50 = arith.mulf %47, %49 : vector<8x256xf32>
    %c15_i32_36 = arith.constant 15 : i32
    %51 = tpu.dynamic_rotate %42 by %c15_i32_36 dim 1 : vector<8x256xf32>, i32 -> vector<8x256xf32>
    %c2_37 = arith.constant 2 : index
    %c0_38 = arith.constant 0 : index
    %c0_39 = arith.constant 0 : index
    %52 = vector.load %arg2[%c2_37, %c0_38, %c0_39] : memref<9x8x256xf32, #tpu.memory_space<vmem>>, vector<1x8x256xf32>
    %53 = vector.shape_cast %52 : vector<1x8x256xf32> to vector<8x256xf32>
    %54 = arith.mulf %51, %53 : vector<8x256xf32>
    %c1_i32_40 = arith.constant 1 : i32
    %55 = tpu.dynamic_rotate %42 by %c1_i32_40 dim 1 : vector<8x256xf32>, i32 -> vector<8x256xf32>
    %c3_41 = arith.constant 3 : index
    %c0_42 = arith.constant 0 : index
    %c0_43 = arith.constant 0 : index
    %56 = vector.load %arg2[%c3_41, %c0_42, %c0_43] : memref<9x8x256xf32, #tpu.memory_space<vmem>>, vector<1x8x256xf32>
    %57 = vector.shape_cast %56 : vector<1x8x256xf32> to vector<8x256xf32>
    %58 = arith.mulf %55, %57 : vector<8x256xf32>
    %c255_i32_44 = arith.constant 255 : i32
    %59 = tpu.dynamic_rotate %42 by %c255_i32_44 dim 1 : vector<8x256xf32>, i32 -> vector<8x256xf32>
    %c5_45 = arith.constant 5 : index
    %c0_46 = arith.constant 0 : index
    %c0_47 = arith.constant 0 : index
    %60 = vector.load %arg2[%c5_45, %c0_46, %c0_47] : memref<9x8x256xf32, #tpu.memory_space<vmem>>, vector<1x8x256xf32>
    %61 = vector.shape_cast %60 : vector<1x8x256xf32> to vector<8x256xf32>
    %62 = arith.mulf %59, %61 : vector<8x256xf32>
    %c241_i32_48 = arith.constant 241 : i32
    %63 = tpu.dynamic_rotate %42 by %c241_i32_48 dim 1 : vector<8x256xf32>, i32 -> vector<8x256xf32>
    %c6_49 = arith.constant 6 : index
    %c0_50 = arith.constant 0 : index
    %c0_51 = arith.constant 0 : index
    %64 = vector.load %arg2[%c6_49, %c0_50, %c0_51] : memref<9x8x256xf32, #tpu.memory_space<vmem>>, vector<1x8x256xf32>
    %65 = vector.shape_cast %64 : vector<1x8x256xf32> to vector<8x256xf32>
    %66 = arith.mulf %63, %65 : vector<8x256xf32>
    %c240_i32_52 = arith.constant 240 : i32
    %67 = tpu.dynamic_rotate %42 by %c240_i32_52 dim 1 : vector<8x256xf32>, i32 -> vector<8x256xf32>
    %c7_53 = arith.constant 7 : index
    %c0_54 = arith.constant 0 : index
    %c0_55 = arith.constant 0 : index
    %68 = vector.load %arg2[%c7_53, %c0_54, %c0_55] : memref<9x8x256xf32, #tpu.memory_space<vmem>>, vector<1x8x256xf32>
    %69 = vector.shape_cast %68 : vector<1x8x256xf32> to vector<8x256xf32>
    %70 = arith.mulf %67, %69 : vector<8x256xf32>
    %c239_i32_56 = arith.constant 239 : i32
    %71 = tpu.dynamic_rotate %42 by %c239_i32_56 dim 1 : vector<8x256xf32>, i32 -> vector<8x256xf32>
    %c8_57 = arith.constant 8 : index
    %c0_58 = arith.constant 0 : index
    %c0_59 = arith.constant 0 : index
    %72 = vector.load %arg2[%c8_57, %c0_58, %c0_59] : memref<9x8x256xf32, #tpu.memory_space<vmem>>, vector<1x8x256xf32>
    %73 = vector.shape_cast %72 : vector<1x8x256xf32> to vector<8x256xf32>
    %74 = arith.mulf %71, %73 : vector<8x256xf32>
    %75 = tpu.concatenate %46, %50, %54, %58, %42, %62, %66, %70, %74, %2 in 0 : vector<8x256xf32>, vector<8x256xf32>, vector<8x256xf32>, vector<8x256xf32>, vector<8x256xf32>, vector<8x256xf32>, vector<8x256xf32>, vector<8x256xf32>, vector<8x256xf32>, vector<8x256xf32> -> vector<80x256xf32>
    %cst_60 = arith.constant dense<0.000000e+00> : vector<8x256xf32>
    %76 = tpu.matmul %6, %75, %cst_60 {dimension_numbers = #tpu.dot_dimension_numbers<[1], [0], [0], [1], [0, 0, 1, 1], [], []>} : vector<8x80xf32>, vector<80x256xf32>, vector<8x256xf32> -> vector<8x256xf32>
    %77 = arith.addf %1, %76 : vector<8x256xf32>
    %c1_61 = arith.constant 1 : index
    %c0_62 = arith.constant 0 : index
    %c0_63 = arith.constant 0 : index
    %78 = vector.load %arg4[%c1_61, %c0_62, %c0_63] : memref<2x8x80xf32, #tpu.memory_space<vmem>>, vector<1x8x80xf32>
    %79 = vector.shape_cast %78 : vector<1x8x80xf32> to vector<8x80xf32>
    %c1_64 = arith.constant 1 : index
    %c0_65 = arith.constant 0 : index
    %c0_66 = arith.constant 0 : index
    %80 = vector.load %arg5[%c1_64, %c0_65, %c0_66] : memref<2x8x80xf32, #tpu.memory_space<vmem>>, vector<1x8x80xf32>
    %81 = vector.shape_cast %80 : vector<1x8x80xf32> to vector<8x80xf32>
    %c17_i32_67 = arith.constant 17 : i32
    %82 = tpu.dynamic_rotate %77 by %c17_i32_67 dim 1 : vector<8x256xf32>, i32 -> vector<8x256xf32>
    %c0_68 = arith.constant 0 : index
    %c0_69 = arith.constant 0 : index
    %c0_70 = arith.constant 0 : index
    %83 = vector.load %arg2[%c0_68, %c0_69, %c0_70] : memref<9x8x256xf32, #tpu.memory_space<vmem>>, vector<1x8x256xf32>
    %84 = vector.shape_cast %83 : vector<1x8x256xf32> to vector<8x256xf32>
    %85 = arith.mulf %82, %84 : vector<8x256xf32>
    %c16_i32_71 = arith.constant 16 : i32
    %86 = tpu.dynamic_rotate %77 by %c16_i32_71 dim 1 : vector<8x256xf32>, i32 -> vector<8x256xf32>
    %c1_72 = arith.constant 1 : index
    %c0_73 = arith.constant 0 : index
    %c0_74 = arith.constant 0 : index
    %87 = vector.load %arg2[%c1_72, %c0_73, %c0_74] : memref<9x8x256xf32, #tpu.memory_space<vmem>>, vector<1x8x256xf32>
    %88 = vector.shape_cast %87 : vector<1x8x256xf32> to vector<8x256xf32>
    %89 = arith.mulf %86, %88 : vector<8x256xf32>
    %c15_i32_75 = arith.constant 15 : i32
    %90 = tpu.dynamic_rotate %77 by %c15_i32_75 dim 1 : vector<8x256xf32>, i32 -> vector<8x256xf32>
    %c2_76 = arith.constant 2 : index
    %c0_77 = arith.constant 0 : index
    %c0_78 = arith.constant 0 : index
    %91 = vector.load %arg2[%c2_76, %c0_77, %c0_78] : memref<9x8x256xf32, #tpu.memory_space<vmem>>, vector<1x8x256xf32>
    %92 = vector.shape_cast %91 : vector<1x8x256xf32> to vector<8x256xf32>
    %93 = arith.mulf %90, %92 : vector<8x256xf32>
    %c1_i32_79 = arith.constant 1 : i32
    %94 = tpu.dynamic_rotate %77 by %c1_i32_79 dim 1 : vector<8x256xf32>, i32 -> vector<8x256xf32>
    %c3_80 = arith.constant 3 : index
    %c0_81 = arith.constant 0 : index
    %c0_82 = arith.constant 0 : index
    %95 = vector.load %arg2[%c3_80, %c0_81, %c0_82] : memref<9x8x256xf32, #tpu.memory_space<vmem>>, vector<1x8x256xf32>
    %96 = vector.shape_cast %95 : vector<1x8x256xf32> to vector<8x256xf32>
    %97 = arith.mulf %94, %96 : vector<8x256xf32>
    %c255_i32_83 = arith.constant 255 : i32
    %98 = tpu.dynamic_rotate %77 by %c255_i32_83 dim 1 : vector<8x256xf32>, i32 -> vector<8x256xf32>
    %c5_84 = arith.constant 5 : index
    %c0_85 = arith.constant 0 : index
    %c0_86 = arith.constant 0 : index
    %99 = vector.load %arg2[%c5_84, %c0_85, %c0_86] : memref<9x8x256xf32, #tpu.memory_space<vmem>>, vector<1x8x256xf32>
    %100 = vector.shape_cast %99 : vector<1x8x256xf32> to vector<8x256xf32>
    %101 = arith.mulf %98, %100 : vector<8x256xf32>
    %c241_i32_87 = arith.constant 241 : i32
    %102 = tpu.dynamic_rotate %77 by %c241_i32_87 dim 1 : vector<8x256xf32>, i32 -> vector<8x256xf32>
    %c6_88 = arith.constant 6 : index
    %c0_89 = arith.constant 0 : index
    %c0_90 = arith.constant 0 : index
    %103 = vector.load %arg2[%c6_88, %c0_89, %c0_90] : memref<9x8x256xf32, #tpu.memory_space<vmem>>, vector<1x8x256xf32>
    %104 = vector.shape_cast %103 : vector<1x8x256xf32> to vector<8x256xf32>
    %105 = arith.mulf %102, %104 : vector<8x256xf32>
    %c240_i32_91 = arith.constant 240 : i32
    %106 = tpu.dynamic_rotate %77 by %c240_i32_91 dim 1 : vector<8x256xf32>, i32 -> vector<8x256xf32>
    %c7_92 = arith.constant 7 : index
    %c0_93 = arith.constant 0 : index
    %c0_94 = arith.constant 0 : index
    %107 = vector.load %arg2[%c7_92, %c0_93, %c0_94] : memref<9x8x256xf32, #tpu.memory_space<vmem>>, vector<1x8x256xf32>
    %108 = vector.shape_cast %107 : vector<1x8x256xf32> to vector<8x256xf32>
    %109 = arith.mulf %106, %108 : vector<8x256xf32>
    %c239_i32_95 = arith.constant 239 : i32
    %110 = tpu.dynamic_rotate %77 by %c239_i32_95 dim 1 : vector<8x256xf32>, i32 -> vector<8x256xf32>
    %c8_96 = arith.constant 8 : index
    %c0_97 = arith.constant 0 : index
    %c0_98 = arith.constant 0 : index
    %111 = vector.load %arg2[%c8_96, %c0_97, %c0_98] : memref<9x8x256xf32, #tpu.memory_space<vmem>>, vector<1x8x256xf32>
    %112 = vector.shape_cast %111 : vector<1x8x256xf32> to vector<8x256xf32>
    %113 = arith.mulf %110, %112 : vector<8x256xf32>
    %114 = tpu.concatenate %85, %89, %93, %97, %77, %101, %105, %109, %113, %2 in 0 : vector<8x256xf32>, vector<8x256xf32>, vector<8x256xf32>, vector<8x256xf32>, vector<8x256xf32>, vector<8x256xf32>, vector<8x256xf32>, vector<8x256xf32>, vector<8x256xf32>, vector<8x256xf32> -> vector<80x256xf32>
    %cst_99 = arith.constant dense<0.000000e+00> : vector<8x256xf32>
    %115 = tpu.matmul %79, %114, %cst_99 {dimension_numbers = #tpu.dot_dimension_numbers<[1], [0], [0], [1], [0, 0, 1, 1], [], []>} : vector<8x80xf32>, vector<80x256xf32>, vector<8x256xf32> -> vector<8x256xf32>
    %cst_100 = arith.constant 0.000000e+00 : f32
    %116 = vector.broadcast %cst_100 : f32 to vector<8x256xf32>
    %117 = arith.maximumf %115, %116 : vector<8x256xf32>
    %c17_i32_101 = arith.constant 17 : i32
    %118 = tpu.dynamic_rotate %117 by %c17_i32_101 dim 1 : vector<8x256xf32>, i32 -> vector<8x256xf32>
    %c0_102 = arith.constant 0 : index
    %c0_103 = arith.constant 0 : index
    %c0_104 = arith.constant 0 : index
    %119 = vector.load %arg2[%c0_102, %c0_103, %c0_104] : memref<9x8x256xf32, #tpu.memory_space<vmem>>, vector<1x8x256xf32>
    %120 = vector.shape_cast %119 : vector<1x8x256xf32> to vector<8x256xf32>
    %121 = arith.mulf %118, %120 : vector<8x256xf32>
    %c16_i32_105 = arith.constant 16 : i32
    %122 = tpu.dynamic_rotate %117 by %c16_i32_105 dim 1 : vector<8x256xf32>, i32 -> vector<8x256xf32>
    %c1_106 = arith.constant 1 : index
    %c0_107 = arith.constant 0 : index
    %c0_108 = arith.constant 0 : index
    %123 = vector.load %arg2[%c1_106, %c0_107, %c0_108] : memref<9x8x256xf32, #tpu.memory_space<vmem>>, vector<1x8x256xf32>
    %124 = vector.shape_cast %123 : vector<1x8x256xf32> to vector<8x256xf32>
    %125 = arith.mulf %122, %124 : vector<8x256xf32>
    %c15_i32_109 = arith.constant 15 : i32
    %126 = tpu.dynamic_rotate %117 by %c15_i32_109 dim 1 : vector<8x256xf32>, i32 -> vector<8x256xf32>
    %c2_110 = arith.constant 2 : index
    %c0_111 = arith.constant 0 : index
    %c0_112 = arith.constant 0 : index
    %127 = vector.load %arg2[%c2_110, %c0_111, %c0_112] : memref<9x8x256xf32, #tpu.memory_space<vmem>>, vector<1x8x256xf32>
    %128 = vector.shape_cast %127 : vector<1x8x256xf32> to vector<8x256xf32>
    %129 = arith.mulf %126, %128 : vector<8x256xf32>
    %c1_i32_113 = arith.constant 1 : i32
    %130 = tpu.dynamic_rotate %117 by %c1_i32_113 dim 1 : vector<8x256xf32>, i32 -> vector<8x256xf32>
    %c3_114 = arith.constant 3 : index
    %c0_115 = arith.constant 0 : index
    %c0_116 = arith.constant 0 : index
    %131 = vector.load %arg2[%c3_114, %c0_115, %c0_116] : memref<9x8x256xf32, #tpu.memory_space<vmem>>, vector<1x8x256xf32>
    %132 = vector.shape_cast %131 : vector<1x8x256xf32> to vector<8x256xf32>
    %133 = arith.mulf %130, %132 : vector<8x256xf32>
    %c255_i32_117 = arith.constant 255 : i32
    %134 = tpu.dynamic_rotate %117 by %c255_i32_117 dim 1 : vector<8x256xf32>, i32 -> vector<8x256xf32>
    %c5_118 = arith.constant 5 : index
    %c0_119 = arith.constant 0 : index
    %c0_120 = arith.constant 0 : index
    %135 = vector.load %arg2[%c5_118, %c0_119, %c0_120] : memref<9x8x256xf32, #tpu.memory_space<vmem>>, vector<1x8x256xf32>
    %136 = vector.shape_cast %135 : vector<1x8x256xf32> to vector<8x256xf32>
    %137 = arith.mulf %134, %136 : vector<8x256xf32>
    %c241_i32_121 = arith.constant 241 : i32
    %138 = tpu.dynamic_rotate %117 by %c241_i32_121 dim 1 : vector<8x256xf32>, i32 -> vector<8x256xf32>
    %c6_122 = arith.constant 6 : index
    %c0_123 = arith.constant 0 : index
    %c0_124 = arith.constant 0 : index
    %139 = vector.load %arg2[%c6_122, %c0_123, %c0_124] : memref<9x8x256xf32, #tpu.memory_space<vmem>>, vector<1x8x256xf32>
    %140 = vector.shape_cast %139 : vector<1x8x256xf32> to vector<8x256xf32>
    %141 = arith.mulf %138, %140 : vector<8x256xf32>
    %c240_i32_125 = arith.constant 240 : i32
    %142 = tpu.dynamic_rotate %117 by %c240_i32_125 dim 1 : vector<8x256xf32>, i32 -> vector<8x256xf32>
    %c7_126 = arith.constant 7 : index
    %c0_127 = arith.constant 0 : index
    %c0_128 = arith.constant 0 : index
    %143 = vector.load %arg2[%c7_126, %c0_127, %c0_128] : memref<9x8x256xf32, #tpu.memory_space<vmem>>, vector<1x8x256xf32>
    %144 = vector.shape_cast %143 : vector<1x8x256xf32> to vector<8x256xf32>
    %145 = arith.mulf %142, %144 : vector<8x256xf32>
    %c239_i32_129 = arith.constant 239 : i32
    %146 = tpu.dynamic_rotate %117 by %c239_i32_129 dim 1 : vector<8x256xf32>, i32 -> vector<8x256xf32>
    %c8_130 = arith.constant 8 : index
    %c0_131 = arith.constant 0 : index
    %c0_132 = arith.constant 0 : index
    %147 = vector.load %arg2[%c8_130, %c0_131, %c0_132] : memref<9x8x256xf32, #tpu.memory_space<vmem>>, vector<1x8x256xf32>
    %148 = vector.shape_cast %147 : vector<1x8x256xf32> to vector<8x256xf32>
    %149 = arith.mulf %146, %148 : vector<8x256xf32>
    %150 = tpu.concatenate %121, %125, %129, %133, %117, %137, %141, %145, %149, %2 in 0 : vector<8x256xf32>, vector<8x256xf32>, vector<8x256xf32>, vector<8x256xf32>, vector<8x256xf32>, vector<8x256xf32>, vector<8x256xf32>, vector<8x256xf32>, vector<8x256xf32>, vector<8x256xf32> -> vector<80x256xf32>
    %cst_133 = arith.constant dense<0.000000e+00> : vector<8x256xf32>
    %151 = tpu.matmul %81, %150, %cst_133 {dimension_numbers = #tpu.dot_dimension_numbers<[1], [0], [0], [1], [0, 0, 1, 1], [], []>} : vector<8x80xf32>, vector<80x256xf32>, vector<8x256xf32> -> vector<8x256xf32>
    %152 = arith.addf %77, %151 : vector<8x256xf32>
    %153 = vector.extract_strided_slice %152 {offsets = [0, 0], sizes = [4, 256], strides = [1, 1]} : vector<8x256xf32> to vector<4x256xf32>
    %c0_134 = arith.constant 0 : index
    %c0_135 = arith.constant 0 : index
    %154 = vector.load %arg6[%c0_134, %c0_135] : memref<4x4xf32, #tpu.memory_space<vmem>>, vector<4x4xf32>
    %155 = vector.extract_strided_slice %152 {offsets = [4, 0], sizes = [4, 256], strides = [1, 1]} : vector<8x256xf32> to vector<4x256xf32>
    %cst_136 = arith.constant dense<0.000000e+00> : vector<4x256xf32>
    %156 = tpu.matmul %154, %155, %cst_136 {dimension_numbers = #tpu.dot_dimension_numbers<[1], [0], [0], [1], [0, 0, 1, 1], [], []>} : vector<4x4xf32>, vector<4x256xf32>, vector<4x256xf32> -> vector<4x256xf32>
    %c0_137 = arith.constant 0 : index
    %c0_138 = arith.constant 0 : index
    %157 = vector.load %arg7[%c0_137, %c0_138] : memref<4x1xf32, #tpu.memory_space<vmem>>, vector<4x1xf32>
    %158 = vector.broadcast %157 : vector<4x1xf32> to vector<4x256xf32>
    %159 = arith.addf %156, %158 : vector<4x256xf32>
    %160 = arith.negf %159 : vector<4x256xf32>
    %161 = math.exp %160 : vector<4x256xf32>
    %cst_139 = arith.constant 1.000000e+00 : f32
    %162 = vector.broadcast %cst_139 : f32 to vector<4x256xf32>
    %163 = arith.addf %162, %161 : vector<4x256xf32>
    %164 = arith.divf %162, %163 : vector<4x256xf32>
    %165 = arith.mulf %153, %164 : vector<4x256xf32>
    %166 = vector.extract_strided_slice %1 {offsets = [0, 0], sizes = [4, 256], strides = [1, 1]} : vector<8x256xf32> to vector<4x256xf32>
    %167 = arith.addf %165, %166 : vector<4x256xf32>
    %c0_140 = arith.constant 0 : index
    %c0_141 = arith.constant 0 : index
    %c0_142 = arith.constant 0 : index
    %168 = vector.load %arg8[%c0_140, %c0_141, %c0_142] : memref<1x4x256xf32, #tpu.memory_space<vmem>>, vector<1x4x256xf32>
    %169 = vector.shape_cast %168 : vector<1x4x256xf32> to vector<4x256xf32>
    %170 = vector.shape_cast %167 : vector<4x256xf32> to vector<1x4x256xf32>
    tpu.vector_store %arg8[%c0_140, %c0_141, %c0_142], %170 {strides = array<i32>} : memref<1x4x256xf32, #tpu.memory_space<vmem>>, vector<1x4x256xf32>,
    return
  }
  func.func @transform_0(%arg0: i32) -> (i32, i32, i32) {
    %c0_i32 = arith.constant 0 : i32
    %c0_i32_0 = arith.constant 0 : i32
    %c0_i32_1 = arith.constant 0 : i32
    return %arg0, %c0_i32, %c0_i32_0 : i32, i32, i32
  }
  func.func @transform_1(%arg0: i32) -> (i32, i32, i32) {
    %c0_i32 = arith.constant 0 : i32
    %c0_i32_0 = arith.constant 0 : i32
    %c0_i32_1 = arith.constant 0 : i32
    %c0_i32_2 = arith.constant 0 : i32
    return %c0_i32, %c0_i32_0, %c0_i32_1 : i32, i32, i32
  }
  func.func @transform_2(%arg0: i32) -> (i32, i32) {
    %c0_i32 = arith.constant 0 : i32
    %c0_i32_0 = arith.constant 0 : i32
    %c0_i32_1 = arith.constant 0 : i32
    return %c0_i32, %c0_i32_0 : i32, i32
  }
  func.func @transform_3(%arg0: i32) -> (i32, i32, i32) {
    %c0_i32 = arith.constant 0 : i32
    %c0_i32_0 = arith.constant 0 : i32
    %c0_i32_1 = arith.constant 0 : i32
    %c0_i32_2 = arith.constant 0 : i32
    return %c0_i32, %c0_i32_0, %c0_i32_1 : i32, i32, i32
  }
  func.func @transform_4(%arg0: i32) -> (i32, i32, i32) {
    %c0_i32 = arith.constant 0 : i32
    %c0_i32_0 = arith.constant 0 : i32
    %c0_i32_1 = arith.constant 0 : i32
    %c0_i32_2 = arith.constant 0 : i32
    return %c0_i32, %c0_i32_0, %c0_i32_1 : i32, i32, i32
  }
  func.func @transform_5(%arg0: i32) -> (i32, i32) {
    %c0_i32 = arith.constant 0 : i32
    %c0_i32_0 = arith.constant 0 : i32
    %c0_i32_1 = arith.constant 0 : i32
    return %c0_i32, %c0_i32_0 : i32, i32
  }
  func.func @transform_6(%arg0: i32) -> (i32, i32) {
    %c0_i32 = arith.constant 0 : i32
    %c0_i32_0 = arith.constant 0 : i32
    %c0_i32_1 = arith.constant 0 : i32
    return %c0_i32, %c0_i32_0 : i32, i32
  }
  func.func @transform_7(%arg0: i32) -> (i32, i32, i32) {
    %c0_i32 = arith.constant 0 : i32
    %c0_i32_0 = arith.constant 0 : i32
    %c0_i32_1 = arith.constant 0 : i32
    return %arg0, %c0_i32, %c0_i32_0 : i32, i32, i32
  }
}

</mosaic_0001>

<bundles_post_ra>
// kernel: tran_bloc_forward.1
= control target key start
LH: loop header
LB: loop body
LE: loop exit
PB: predicated region body
PF: predicated region fallthrough
CT: control target
= control target key end

     0   :  { %s1049_s24 = smov 0   ;;  %s1513_s0 = inlined_call_operand.vmem [shape: f32[2,8,256], index: 0, kind: input, shape index: {}]   ;;  %s1514_s1 = inlined_call_operand.vmem [shape: f32[9,8,256], index: 1, kind: input, shape index: {}]   ;;  %s1515_s2 = inlined_call_operand.vmem [shape: f32[8,256], index: 2, kind: input, shape index: {}]   ;;  %s1516_s3 = inlined_call_operand.vmem [shape: f32[2,8,80], index: 3, kind: input, shape index: {}]   ;;  %s1517_s4 = inlined_call_operand.vmem [shape: f32[2,8,80], index: 4, kind: input, shape index: {}]   ;;  %s1518_s5 = inlined_call_operand.vmem [shape: f32[4,4], index: 5, kind: input, shape index: {}]   ;;  %s1519_s6 = inlined_call_operand.vmem [shape: f32[4,1], index: 6, kind: input, shape index: {}]   ;;  %s1520_s7 = inlined_call_operand.vmem [shape: f32[2,4,256], index: 7, kind: output, shape index: {}]  }
   0x1 LB: > { %s922_s25 = sadd.s32 4294967295, %s998_s24   ;;  %p926_p0 = scmp.ge.s32.totalorder %s998_s24, 1  ;;  %s998_s24 = sphi %s1049_s24, %s17_s24  }
   0x2   : > { %p237_p1 = scmp.lt.s32.totalorder %s998_s24, 3 }
   0x4   : > { %p238_p2 = pnand %p926_p0, %p237_p1 }
   0x5   : > { %p269_p3 = scmp.lt.s32.totalorder (!%p238_p2), %s922_s25, 1  ;;  %s1000_s30 = smov (!%p238_p2), 112  }
   0x6   : > { %241 = sbr.rel (%p238_p2) target bundleno = 1338 (0x53a), region = 48  ;;  %s1001_s8 = smov (!%p238_p2), 111  }
   0x7   : > { %s1002_s9 = smov (!%p238_p2), 113   ;;  %s1003_s10 = smov (!%p238_p2), 127  }
   0x8   : > { %s1004_s11 = smov (!%p238_p2), 1   ;;  %s1005_s12 = smov (!%p238_p2), 15  }
   0x9   : > { %s1006_s13 = smov (!%p238_p2), 16   ;;  %s1007_s14 = smov (!%p238_p2), 17  }
   0xb   : > { %s1522_s25 = smov (!%p269_p3, %s922_s25), 1  ;;  %v1102_v2 = vld [vmem:[%s1515_s2] sm:$0xff]  ;;  %v1107_v3 = vld [vmem:[%s1515_s2 + $0x8] sm:$0xff]  ;;  %v289_v5 = vlaneseq  ;;  %v1139_v18 = vld [vmem:[%s1514_s1 + $0x70] sm:$0xff]  ;;  %vm382_vm8 = vcmask 654336   ;;  %vm774_vm9 = vcmask 1043456  }
   0xc   : > { %s963_s26 = sshll.u32 %s1522_s25, 4  ;;  %392 = vmatpush.msra.mxu0 %v1102_v2  ;;  %412 = vmatpush.msra.mxu1 %v1107_v3  ;;  %v1120_v10 = vld [vmem:[%s1514_s1 + $0x80] sm:$0xff]  ;;  %v1125_v11 = vld [vmem:[%s1514_s1 + $0x88] sm:$0xff]  ;;  %v1144_v19 = vld [vmem:[%s1514_s1 + $0x78] sm:$0xff]  ;;  %vm770_vm10 = vcmask 31744  }
   0xd   : > { %s273_s29 = scalar_lea.vmem %s1513_s0, %s963_s26  ;;  %501 = vmatpush.msra.mxu2 %v1102_v2  ;;  %521 = vmatpush.msra.mxu3 %v1107_v3  ;;  %v1113_v8 = vand.u32 127, %v289_v5  ;;  %v1155_v24 = vld [vmem:[%s1514_s1 + $0x60] sm:$0xff]  ;;  %v1160_v25 = vld [vmem:[%s1514_s1 + $0x68] sm:$0xff]  ;;  %v1170_v31 = vld [vmem:[%s1514_s1 + $0x50] sm:$0xff] }
   0xe   : > { %v1063_v0 = vld [vmem:[%s273_s29] sm:$0xff]  ;;  %v1071_v1 = vld [vmem:[%s273_s29 + $0x8] sm:$0xff]  ;;  %v1175_v32 = vld [vmem:[%s1514_s1 + $0x58] sm:$0xff] }
   0xf   : > { %358 = vrot.lane.b32.xlu1 %v1063_v0, %s1000_s30  ;;  %370 = vrot.lane.b32.xlu0 %v1063_v0, %s1001_s8  ;;  %vm362_vm0 = vcmp.lt.s32.totalorder %v1113_v8, 112  ;;  %vm374_vm1 = vcmp.lt.s32.totalorder %v1113_v8, 111  ;;  %vm350_vm2 = vcmp.lt.s32.totalorder %v1113_v8, 113  ;;  %vm338_vm3 = vcmp.lt.s32.totalorder %v1113_v8, 127  ;;  %v1189_v39 = vld [vmem:[%s1514_s1 + $0x30] sm:$0xff]  ;;  %v1195_v41 = vld [vmem:[%s1514_s1 + $0x38] sm:$0xff] }
  0x10   : > { %346 = vrot.lane.b32.xlu2 %v1063_v0, %s1002_s9  ;;  %vm326_vm4 = vcmp.lt.s32.totalorder %v1113_v8, 1  ;;  %vm314_vm5 = vcmp.lt.s32.totalorder %v1113_v8, 15  ;;  %v1200_v42 = vld [vmem:[%s1514_s1 + $0x20] sm:$0xff]  ;;  %v1205_v43 = vld [vmem:[%s1514_s1 + $0x28] sm:$0xff]  ;;  %vm302_vm6 = vcmp.lt.s32.totalorder %v1113_v8, 16  ;;  %v1223_v54 = vld [vmem:[%s1514_s1 + $0x10] sm:$0xff] }
  0x11   : > { %v1228_v55 = vld [vmem:[%s1514_s1 + $0x18] sm:$0xff]  ;;  %vm291_vm7 = vcmp.lt.s32.totalorder %v1113_v8, 17  ;;  %v1240_v63 = vld [vmem:[%s1514_s1] sm:$0xff]  ;;  %v1008_v8 = vmov 0  }
  0x12   : > { %982 = vset.pattern.permute.xlu1 %v1008_v8  ;;  %983 = vset.pattern.permute.xlu0 %v1008_v8 }
  0x17   : > { %360 = vrot.lane.b32.xlu1 %v1071_v1, %s1000_s30  ;;  %372 = vrot.lane.b32.xlu0 %v1071_v1, %s1001_s8 }
  0x18   : > { %348 = vrot.lane.b32.xlu2 %v1071_v1, %s1002_s9 }
  0x1f   : > { %336 = vrot.lane.b32.xlu1 %v1071_v1, %s1003_s10  ;;  %334 = vrot.lane.b32.xlu0 %v1063_v0, %s1003_s10 }
  0x20   : > { %322 = vrot.lane.b32.xlu2 %v1063_v0, %s1004_s11 }
  0x27   : > { %310 = vrot.lane.b32.xlu1 %v1063_v0, %s1005_s12  ;;  %324 = vrot.lane.b32.xlu0 %v1071_v1, %s1004_s11 }
  0x28   : > { %312 = vrot.lane.b32.xlu2 %v1071_v1, %s1005_s12 }
  0x2f   : > { %300 = vrot.lane.b32.xlu1 %v1071_v1, %s1006_s13  ;;  %298 = vrot.lane.b32.xlu0 %v1063_v0, %s1006_s13 }
  0x30   : > { %285 = vrot.lane.b32.xlu2 %v1063_v0, %s1007_s14 }
  0x37   : > { %287 = vrot.lane.b32.xlu0 %v1071_v1, %s1007_s14 }
  0x6a   : > { %v347_v4 = vpop.permute.xlu2 %346 }
  0x72   : > { %v349_v9 = vpop.permute.xlu2 %348 }
  0x73   : > { %v351_v22 = vsel %vm350_vm2, %v347_v4, %v349_v9  ;;  %v352_v23 = vsel %vm350_vm2, %v349_v9, %v347_v4  ;;  %v1245_v4 = vld [vmem:[%s1514_s1 + $0x8] sm:$0xff] }
  0x74   : > { %v356_v29 = vmul.f32 %v1155_v24, %v351_v22  ;;  %v357_v30 = vmul.f32 %v1160_v25, %v352_v23 }
  0x7a   : > { %v323_v28 = vpop.permute.xlu2 %322 }
  0x81   : > { %v359_v6 = vpop.permute.xlu1 %358  ;;  %v371_v7 = vpop.permute.xlu0 %370 }
  0x82   : > { %v313_v40 = vpop.permute.xlu2 %312 }
  0x89   : > { %v361_v12 = vpop.permute.xlu1 %360  ;;  %v373_v13 = vpop.permute.xlu0 %372 }
  0x8a   : > { %v363_v14 = vsel %vm362_vm0, %v359_v6, %v361_v12  ;;  %v364_v15 = vsel %vm362_vm0, %v361_v12, %v359_v6  ;;  %v375_v16 = vsel %vm374_vm1, %v371_v7, %v373_v13  ;;  %v376_v17 = vsel %vm374_vm1, %v373_v13, %v371_v7  ;;  %v286_v62 = vpop.permute.xlu2 %285  ;;  %v283_v13 = vld [vmem:[%s1516_s3] sm:$0xff] }
  0x8b   : > { %v380_v20 = vmul.f32 %v1120_v10, %v375_v16  ;;  %v381_v21 = vmul.f32 %v1125_v11, %v376_v17  ;;  %v368_v26 = vmul.f32 %v1139_v18, %v363_v14  ;;  %v369_v27 = vmul.f32 %v1144_v19, %v364_v15 }
  0x8d   : > { %393 = vmatpush.msra.mxu0 %v380_v20  ;;  %413 = vmatpush.msra.mxu1 %v381_v21 }
  0x8f   : > { %394 = vmatpush.msra.mxu0 %v368_v26  ;;  %414 = vmatpush.msra.mxu1 %v369_v27 }
  0x91   : > { %v337_v33 = vpop.permute.xlu1 %336  ;;  %395 = vmatpush.msra.mxu0 %v356_v29  ;;  %415 = vmatpush.msra.mxu1 %v357_v30  ;;  %v335_v34 = vpop.permute.xlu0 %334 }
  0x92   : > { %v339_v35 = vsel %vm338_vm3, %v335_v34, %v337_v33  ;;  %v340_v36 = vsel %vm338_vm3, %v337_v33, %v335_v34 }
  0x93   : > { %v344_v37 = vmul.f32 %v1170_v31, %v339_v35  ;;  %v345_v38 = vmul.f32 %v1175_v32, %v340_v36 }
  0x95   : > { %396 = vmatpush.msra.mxu0 %v344_v37  ;;  %416 = vmatpush.msra.mxu1 %v345_v38 }
  0x97   : > { %397 = vmatpush.msra.mxu0 %v1063_v0  ;;  %417 = vmatpush.msra.mxu1 %v1071_v1 }
  0x99   : > { %v311_v44 = vpop.permute.xlu1 %310  ;;  %v325_v45 = vpop.permute.xlu0 %324 }
  0x9a   : > { %v327_v46 = vsel %vm326_vm4, %v323_v28, %v325_v45  ;;  %v328_v47 = vsel %vm326_vm4, %v325_v45, %v323_v28  ;;  %v315_v48 = vsel %vm314_vm5, %v311_v44, %v313_v40  ;;  %v316_v49 = vsel %vm314_vm5, %v313_v40, %v311_v44 }
  0x9b   : > { %v332_v50 = vmul.f32 %v1189_v39, %v328_v47  ;;  %v333_v51 = vmul.f32 %v1195_v41, %v327_v46  ;;  %v320_v52 = vmul.f32 %v1200_v42, %v316_v49  ;;  %v321_v53 = vmul.f32 %v1205_v43, %v315_v48 }
  0x9d   : > { %398 = vmatpush.msra.mxu0 %v332_v50  ;;  %418 = vmatpush.msra.mxu1 %v333_v51 }
  0x9f   : > { %399 = vmatpush.msra.mxu0 %v320_v52  ;;  %419 = vmatpush.msra.mxu1 %v321_v53 }
  0xa1   : > { %v301_v56 = vpop.permute.xlu1 %300  ;;  %v299_v57 = vpop.permute.xlu0 %298 }
  0xa2   : > { %v303_v58 = vsel %vm302_vm6, %v299_v57, %v301_v56  ;;  %v304_v59 = vsel %vm302_vm6, %v301_v56, %v299_v57 }
  0xa3   : > { %v308_v60 = vmul.f32 %v1223_v54, %v304_v59  ;;  %v309_v61 = vmul.f32 %v1228_v55, %v303_v58 }
  0xa5   : > { %400 = vmatpush.msra.mxu0 %v308_v60  ;;  %420 = vmatpush.msra.mxu1 %v309_v61 }
  0xa9   : > { %v288_v5 = vpop.permute.xlu0 %287 }
  0xaa   : > { %v292_v6 = vsel %vm291_vm7, %v286_v62, %v288_v5  ;;  %v293_v7 = vsel %vm291_vm7, %v288_v5, %v286_v62 }
  0xab   : > { %v296_v9 = vmul.f32 %v1240_v63, %v293_v7  ;;  %v297_v12 = vmul.f32 %v1245_v4, %v292_v6 }
  0xad   : > { %401 = vmatpush.msra.mxu0 %v296_v9  ;;  %421 = vmatpush.msra.mxu1 %v297_v12 }
  0xae   : > { %945 = vmatmul.msk.f32.vlgmr.msra.gmra.mxu0 %vm382_vm8, %v283_v13  ;;  %946 = vmatmul.msk.f32.vlgmr.msra.gmra.mxu1 %vm382_vm8, %v283_v13 }
  0xaf   : > { %614 = vmatpush.msrb.mxu0 %v1102_v2  ;;  %634 = vmatpush.msrb.mxu1 %v1107_v3 }
 0x12b   : > { %v403_v14 = vpop.f32.mrf.mxu0  ;;  %v423_v15 = vpop.f32.mrf.mxu1 }
 0x12c   : > { %v426_v16 = vmax.f32 %v403_v14, 0.0  ;;  %v427_v17 = vmax.f32 %v423_v15, 0.0 }
 0x12e   : > { %476 = vrot.lane.b32.xlu0 %v426_v16, %s1000_s30  ;;  %484 = vrot.lane.b32.xlu1 %v426_v16, %s1001_s8 }
 0x12f   : > { %486 = vrot.lane.b32.xlu2 %v427_v17, %s1001_s8 }
 0x136   : > { %470 = vrot.lane.b32.xlu0 %v427_v17, %s1002_s9  ;;  %478 = vrot.lane.b32.xlu1 %v427_v17, %s1000_s30 }
 0x137   : > { %468 = vrot.lane.b32.xlu2 %v426_v16, %s1002_s9 }
 0x13e   : > { %452 = vrot.lane.b32.xlu0 %v426_v16, %s1004_s11  ;;  %460 = vrot.lane.b32.xlu1 %v426_v16, %s1003_s10 }
 0x13f   : > { %462 = vrot.lane.b32.xlu2 %v427_v17, %s1003_s10 }
 0x146   : > { %446 = vrot.lane.b32.xlu0 %v427_v17, %s1005_s12  ;;  %454 = vrot.lane.b32.xlu1 %v427_v17, %s1004_s11 }
 0x147   : > { %444 = vrot.lane.b32.xlu2 %v426_v16, %s1005_s12 }
 0x14e   : > { %428 = vrot.lane.b32.xlu0 %v426_v16, %s1007_s14  ;;  %436 = vrot.lane.b32.xlu1 %v426_v16, %s1006_s13 }
 0x14f   : > { %438 = vrot.lane.b32.xlu2 %v427_v17, %s1006_s13 }
 0x156   : > { %430 = vrot.lane.b32.xlu1 %v427_v17, %s1007_s14 }
 0x189   : > { %v487_v20 = vpop.permute.xlu2 %486 }
 0x191   : > { %v469_v27 = vpop.permute.xlu2 %468 }
 0x199   : > { %v463_v44 = vpop.permute.xlu2 %462 }
 0x1a0   : > { %v477_v21 = vpop.permute.xlu0 %476  ;;  %v485_v22 = vpop.permute.xlu1 %484 }
 0x1a1   : > { %v488_v23 = vsel %vm374_vm1, %v485_v22, %v487_v20  ;;  %v489_v26 = vsel %vm374_vm1, %v487_v20, %v485_v22  ;;  %v445_v53 = vpop.permute.xlu2 %444 }
 0x1a2   : > { %v490_v28 = vmul.f32 %v1120_v10, %v488_v23  ;;  %v491_v29 = vmul.f32 %v1125_v11, %v489_v26 }
 0x1a4   : > { %502 = vmatpush.msra.mxu2 %v490_v28  ;;  %522 = vmatpush.msra.mxu3 %v491_v29 }
 0x1a8   : > { %v471_v30 = vpop.permute.xlu0 %470  ;;  %v479_v33 = vpop.permute.xlu1 %478 }
 0x1a9   : > { %v472_v34 = vsel %vm350_vm2, %v469_v27, %v471_v30  ;;  %v473_v35 = vsel %vm350_vm2, %v471_v30, %v469_v27  ;;  %v480_v36 = vsel %vm362_vm0, %v477_v21, %v479_v33  ;;  %v481_v37 = vsel %vm362_vm0, %v479_v33, %v477_v21  ;;  %v439_v9 = vpop.permute.xlu2 %438  ;;  %v284_v27 = vld [vmem:[%s1517_s4] sm:$0xff] }
 0x1aa   : > { %v482_v38 = vmul.f32 %v1139_v18, %v480_v36  ;;  %v483_v40 = vmul.f32 %v1144_v19, %v481_v37  ;;  %v474_v45 = vmul.f32 %v1155_v24, %v472_v34  ;;  %v475_v46 = vmul.f32 %v1160_v25, %v473_v35 }
 0x1ac   : > { %503 = vmatpush.msra.mxu2 %v482_v38  ;;  %523 = vmatpush.msra.mxu3 %v483_v40 }
 0x1ae   : > { %504 = vmatpush.msra.mxu2 %v474_v45  ;;  %524 = vmatpush.msra.mxu3 %v475_v46 }
 0x1b0   : > { %v453_v47 = vpop.permute.xlu0 %452  ;;  %v461_v48 = vpop.permute.xlu1 %460 }
 0x1b1   : > { %v464_v49 = vsel %vm338_vm3, %v461_v48, %v463_v44  ;;  %v465_v50 = vsel %vm338_vm3, %v463_v44, %v461_v48 }
 0x1b2   : > { %v466_v51 = vmul.f32 %v1170_v31, %v464_v49  ;;  %v467_v52 = vmul.f32 %v1175_v32, %v465_v50 }
 0x1b4   : > { %505 = vmatpush.msra.mxu2 %v466_v51  ;;  %525 = vmatpush.msra.mxu3 %v467_v52 }
 0x1b6   : > { %506 = vmatpush.msra.mxu2 %v426_v16  ;;  %526 = vmatpush.msra.mxu3 %v427_v17 }
 0x1b8   : > { %v447_v56 = vpop.permute.xlu0 %446  ;;  %v455_v57 = vpop.permute.xlu1 %454 }
 0x1b9   : > { %v448_v58 = vsel %vm314_vm5, %v445_v53, %v447_v56  ;;  %v449_v59 = vsel %vm314_vm5, %v447_v56, %v445_v53  ;;  %v456_v60 = vsel %vm326_vm4, %v453_v47, %v455_v57  ;;  %v457_v61 = vsel %vm326_vm4, %v455_v57, %v453_v47 }
 0x1ba   : > { %v458_v62 = vmul.f32 %v1189_v39, %v457_v61  ;;  %v459_v5 = vmul.f32 %v1195_v41, %v456_v60  ;;  %v450_v6 = vmul.f32 %v1200_v42, %v449_v59  ;;  %v451_v7 = vmul.f32 %v1205_v43, %v448_v58 }
 0x1bc   : > { %507 = vmatpush.msra.mxu2 %v458_v62  ;;  %527 = vmatpush.msra.mxu3 %v459_v5 }
 0x1be   : > { %508 = vmatpush.msra.mxu2 %v450_v6  ;;  %528 = vmatpush.msra.mxu3 %v451_v7 }
 0x1c0   : > { %v437_v12 = vpop.permute.xlu1 %436  ;;  %v429_v17 = vpop.permute.xlu0 %428 }
 0x1c1   : > { %v440_v13 = vsel %vm302_vm6, %v437_v12, %v439_v9  ;;  %v441_v14 = vsel %vm302_vm6, %v439_v9, %v437_v12 }
 0x1c2   : > { %v442_v15 = vmul.f32 %v1223_v54, %v441_v14  ;;  %v443_v16 = vmul.f32 %v1228_v55, %v440_v13 }
 0x1c4   : > { %509 = vmatpush.msra.mxu2 %v442_v15  ;;  %529 = vmatpush.msra.mxu3 %v443_v16 }
 0x1c8   : > { %v431_v20 = vpop.permute.xlu1 %430 }
 0x1c9   : > { %v432_v21 = vsel %vm291_vm7, %v429_v17, %v431_v20  ;;  %v433_v22 = vsel %vm291_vm7, %v431_v20, %v429_v17 }
 0x1ca   : > { %v434_v23 = vmul.f32 %v433_v22, %v1240_v63  ;;  %v435_v26 = vmul.f32 %v432_v21, %v1245_v4 }
 0x1cc   : > { %510 = vmatpush.msra.mxu2 %v434_v23  ;;  %530 = vmatpush.msra.mxu3 %v435_v26 }
 0x1cd   : > { %947 = vmatmul.msk.f32.vlgmr.msra.gmra.mxu2 %vm382_vm8, %v284_v27  ;;  %948 = vmatmul.msk.f32.vlgmr.msra.gmra.mxu3 %vm382_vm8, %v284_v27 }
 0x1ce   : > { %723 = vmatpush.msrb.mxu2 %v1102_v2  ;;  %743 = vmatpush.msrb.mxu3 %v1107_v3 }
 0x250   : > { %v512_v28 = vpop.f32.mrf.mxu2  ;;  %v532_v29 = vpop.f32.mrf.mxu3 }
 0x251   : > { %v1332_v30 = vadd.f32 %v512_v28, %v1063_v0  ;;  %v1335_v33 = vadd.f32 %v532_v29, %v1071_v1 }
 0x253   : > { %589 = vrot.lane.b32.xlu1 %v1332_v30, %s1000_s30  ;;  %597 = vrot.lane.b32.xlu2 %v1332_v30, %s1001_s8 }
 0x254   : > { %599 = vrot.lane.b32.xlu0 %v1335_v33, %s1001_s8 }
 0x25b   : > { %583 = vrot.lane.b32.xlu1 %v1335_v33, %s1002_s9  ;;  %591 = vrot.lane.b32.xlu2 %v1335_v33, %s1000_s30 }
 0x25c   : > { %581 = vrot.lane.b32.xlu0 %v1332_v30, %s1002_s9 }
 0x263   : > { %565 = vrot.lane.b32.xlu1 %v1332_v30, %s1004_s11  ;;  %573 = vrot.lane.b32.xlu2 %v1332_v30, %s1003_s10 }
 0x264   : > { %575 = vrot.lane.b32.xlu0 %v1335_v33, %s1003_s10 }
 0x26b   : > { %559 = vrot.lane.b32.xlu1 %v1335_v33, %s1005_s12  ;;  %567 = vrot.lane.b32.xlu2 %v1335_v33, %s1004_s11 }
 0x26c   : > { %557 = vrot.lane.b32.xlu0 %v1332_v30, %s1005_s12 }
 0x273   : > { %541 = vrot.lane.b32.xlu1 %v1332_v30, %s1007_s14  ;;  %549 = vrot.lane.b32.xlu2 %v1332_v30, %s1006_s13 }
 0x274   : > { %551 = vrot.lane.b32.xlu0 %v1335_v33, %s1006_s13 }
 0x27b   : > { %543 = vrot.lane.b32.xlu2 %v1335_v33, %s1007_s14 }
 0x2ad   : > { %v598_v2 = vpop.permute.xlu2 %597 }
 0x2b5   : > { %v592_v3 = vpop.permute.xlu2 %591 }
 0x2bd   : > { %v574_v44 = vpop.permute.xlu2 %573 }
 0x2c5   : > { %v590_v34 = vpop.permute.xlu1 %589  ;;  %v568_v57 = vpop.permute.xlu2 %567 }
 0x2c6   : > { %v600_v35 = vpop.permute.xlu0 %599  ;;  %v593_v36 = vsel %vm362_vm0, %v590_v34, %v592_v3  ;;  %v594_v37 = vsel %vm362_vm0, %v592_v3, %v590_v34 }
 0x2c7   : > { %v601_v38 = vsel %vm374_vm1, %v598_v2, %v600_v35  ;;  %v602_v40 = vsel %vm374_vm1, %v600_v35, %v598_v2  ;;  %v595_v47 = vmul.f32 %v1139_v18, %v593_v36  ;;  %v596_v48 = vmul.f32 %v1144_v19, %v594_v37  ;;  %v949_v37 = vld [vmem:[%s1516_s3 + $0x8] sm:$0xff] }
 0x2c8   : > { %v603_v45 = vmul.f32 %v1120_v10, %v601_v38  ;;  %v604_v46 = vmul.f32 %v1125_v11, %v602_v40 }
 0x2ca   : > { %615 = vmatpush.msrb.mxu0 %v603_v45  ;;  %635 = vmatpush.msrb.mxu1 %v604_v46 }
 0x2cc   : > { %616 = vmatpush.msrb.mxu0 %v595_v47  ;;  %636 = vmatpush.msrb.mxu1 %v596_v48 }
 0x2cd   : > { %v584_v49 = vpop.permute.xlu1 %583  ;;  %v550_v9 = vpop.permute.xlu2 %549 }
 0x2ce   : > { %v582_v50 = vpop.permute.xlu0 %581 }
 0x2cf   : > { %v585_v51 = vsel %vm350_vm2, %v582_v50, %v584_v49  ;;  %v586_v52 = vsel %vm350_vm2, %v584_v49, %v582_v50 }
 0x2d0   : > { %v587_v53 = vmul.f32 %v1155_v24, %v585_v51  ;;  %v588_v56 = vmul.f32 %v1160_v25, %v586_v52 }
 0x2d2   : > { %617 = vmatpush.msrb.mxu0 %v587_v53  ;;  %637 = vmatpush.msrb.mxu1 %v588_v56 }
 0x2d5   : > { %v566_v58 = vpop.permute.xlu1 %565  ;;  %v544_v23 = vpop.permute.xlu2 %543 }
 0x2d6   : > { %v576_v59 = vpop.permute.xlu0 %575  ;;  %v569_v6 = vsel %vm326_vm4, %v566_v58, %v568_v57  ;;  %v570_v7 = vsel %vm326_vm4, %v568_v57, %v566_v58 }
 0x2d7   : > { %v577_v60 = vsel %vm338_vm3, %v574_v44, %v576_v59  ;;  %v578_v61 = vsel %vm338_vm3, %v576_v59, %v574_v44  ;;  %v571_v12 = vmul.f32 %v1189_v39, %v570_v7  ;;  %v572_v13 = vmul.f32 %v1195_v41, %v569_v6 }
 0x2d8   : > { %v579_v62 = vmul.f32 %v1170_v31, %v577_v60  ;;  %v580_v5 = vmul.f32 %v1175_v32, %v578_v61 }
 0x2da   : > { %618 = vmatpush.msrb.mxu0 %v579_v62  ;;  %638 = vmatpush.msrb.mxu1 %v580_v5 }
 0x2dc   : > { %619 = vmatpush.msrb.mxu0 %v1332_v30  ;;  %639 = vmatpush.msrb.mxu1 %v1335_v33 }
 0x2dd   : > { %v560_v14 = vpop.permute.xlu1 %559 }
 0x2de   : > { %620 = vmatpush.msrb.mxu0 %v571_v12  ;;  %640 = vmatpush.msrb.mxu1 %v572_v13  ;;  %v558_v15 = vpop.permute.xlu0 %557 }
 0x2df   : > { %v561_v16 = vsel %vm314_vm5, %v558_v15, %v560_v14  ;;  %v562_v17 = vsel %vm314_vm5, %v560_v14, %v558_v15 }
 0x2e0   : > { %v563_v20 = vmul.f32 %v1200_v42, %v562_v17  ;;  %v564_v21 = vmul.f32 %v1205_v43, %v561_v16 }
 0x2e2   : > { %621 = vmatpush.msrb.mxu0 %v563_v20  ;;  %641 = vmatpush.msrb.mxu1 %v564_v21 }
 0x2e5   : > { %v542_v22 = vpop.permute.xlu1 %541 }
 0x2e6   : > { %v552_v26 = vpop.permute.xlu0 %551  ;;  %v545_v27 = vsel %vm291_vm7, %v542_v22, %v544_v23  ;;  %v546_v28 = vsel %vm291_vm7, %v544_v23, %v542_v22 }
 0x2e7   : > { %v553_v29 = vsel %vm302_vm6, %v550_v9, %v552_v26  ;;  %v554_v2 = vsel %vm302_vm6, %v552_v26, %v550_v9  ;;  %v547_v35 = vmul.f32 %v546_v28, %v1240_v63  ;;  %v548_v36 = vmul.f32 %v545_v27, %v1245_v4 }
 0x2e8   : > { %v555_v3 = vmul.f32 %v1223_v54, %v554_v2  ;;  %v556_v34 = vmul.f32 %v1228_v55, %v553_v29 }
 0x2ea   : > { %622 = vmatpush.msrb.mxu0 %v555_v3  ;;  %642 = vmatpush.msrb.mxu1 %v556_v34 }
 0x2ec   : > { %623 = vmatpush.msrb.mxu0 %v547_v35  ;;  %643 = vmatpush.msrb.mxu1 %v548_v36 }
 0x2ed   : > { %951 = vmatmul.msk.f32.vlgmr.msrb.gmra.mxu0 %vm382_vm8, %v949_v37  ;;  %952 = vmatmul.msk.f32.vlgmr.msrb.gmra.mxu1 %vm382_vm8, %v949_v37 }
 0x36a   : > { %v625_v38 = vpop.f32.mrf.mxu0  ;;  %v645_v40 = vpop.f32.mrf.mxu1 }
 0x36b   : > { %v648_v44 = vmax.f32 %v625_v38, 0.0  ;;  %v649_v45 = vmax.f32 %v645_v40, 0.0  ;;  %v759_v40 = vld [vmem:[%s1518_s5] sm:$0xf] }
 0x36d   : > { %698 = vrot.lane.b32.xlu2 %v648_v44, %s1000_s30  ;;  %706 = vrot.lane.b32.xlu0 %v648_v44, %s1001_s8 }
 0x36e   : > { %708 = vrot.lane.b32.xlu1 %v649_v45, %s1001_s8 }
 0x375   : > { %692 = vrot.lane.b32.xlu2 %v649_v45, %s1002_s9  ;;  %700 = vrot.lane.b32.xlu0 %v649_v45, %s1000_s30 }
 0x376   : > { %690 = vrot.lane.b32.xlu1 %v648_v44, %s1002_s9 }
 0x37d   : > { %674 = vrot.lane.b32.xlu2 %v648_v44, %s1004_s11  ;;  %682 = vrot.lane.b32.xlu0 %v648_v44, %s1003_s10 }
 0x37e   : > { %684 = vrot.lane.b32.xlu1 %v649_v45, %s1003_s10 }
 0x385   : > { %668 = vrot.lane.b32.xlu2 %v649_v45, %s1005_s12  ;;  %676 = vrot.lane.b32.xlu0 %v649_v45, %s1004_s11 }
 0x386   : > { %666 = vrot.lane.b32.xlu1 %v648_v44, %s1005_s12 }
 0x38d   : > { %650 = vrot.lane.b32.xlu2 %v648_v44, %s1007_s14  ;;  %658 = vrot.lane.b32.xlu0 %v648_v44, %s1006_s13 }
 0x38e   : > { %660 = vrot.lane.b32.xlu1 %v649_v45, %s1006_s13  ;;  %s964_s13 = sshll.u32 %s1522_s25, 3 }
 0x38f   : > { %s278_s19 = scalar_lea.vmem %s1520_s7, %s964_s13 }
 0x395   : > { %652 = vrot.lane.b32.xlu0 %v649_v45, %s1007_s14 }
 0x3c7   : > { %v699_v46 = vpop.permute.xlu2 %698 }
 0x3cf   : > { %v693_v53 = vpop.permute.xlu2 %692 }
 0x3d7   : > { %v675_v6 = vpop.permute.xlu2 %674 }
 0x3df   : > { %v707_v47 = vpop.permute.xlu0 %706 }
 0x3e0   : > { %v709_v48 = vpop.permute.xlu1 %708 }
 0x3e1   : > { %v710_v49 = vsel %vm374_vm1, %v707_v47, %v709_v48  ;;  %v711_v50 = vsel %vm374_vm1, %v709_v48, %v707_v47 }
 0x3e2   : > { %v712_v51 = vmul.f32 %v1120_v10, %v710_v49  ;;  %v713_v52 = vmul.f32 %v1125_v11, %v711_v50 }
 0x3e4   : > { %724 = vmatpush.msrb.mxu2 %v712_v51  ;;  %744 = vmatpush.msrb.mxu3 %v713_v52 }
 0x3e7   : > { %v701_v56 = vpop.permute.xlu0 %700 }
 0x3e8   : > { %v702_v57 = vsel %vm362_vm0, %v699_v46, %v701_v56  ;;  %v703_v58 = vsel %vm362_vm0, %v701_v56, %v699_v46  ;;  %v691_v59 = vpop.permute.xlu1 %690 }
 0x3e9   : > { %v694_v60 = vsel %vm350_vm2, %v691_v59, %v693_v53  ;;  %v695_v61 = vsel %vm350_vm2, %v693_v53, %v691_v59  ;;  %v704_v10 = vmul.f32 %v1139_v18, %v702_v57  ;;  %v705_v11 = vmul.f32 %v1144_v19, %v703_v58 }
 0x3ea   : > { %v696_v62 = vmul.f32 %v1155_v24, %v694_v60  ;;  %v697_v5 = vmul.f32 %v1160_v25, %v695_v61  ;;  %v669_v25 = vpop.permute.xlu2 %668 }
 0x3eb   : > { %725 = vmatpush.msrb.mxu2 %v704_v10  ;;  %745 = vmatpush.msrb.mxu3 %v705_v11 }
 0x3ed   : > { %726 = vmatpush.msrb.mxu2 %v696_v62  ;;  %746 = vmatpush.msrb.mxu3 %v697_v5 }
 0x3ef   : > { %v683_v7 = vpop.permute.xlu0 %682 }
 0x3f0   : > { %v685_v9 = vpop.permute.xlu1 %684 }
 0x3f1   : > { %v686_v12 = vsel %vm338_vm3, %v683_v7, %v685_v9  ;;  %v687_v13 = vsel %vm338_vm3, %v685_v9, %v683_v7 }
 0x3f2   : > { %v688_v18 = vmul.f32 %v1170_v31, %v686_v12  ;;  %v689_v19 = vmul.f32 %v1175_v32, %v687_v13  ;;  %v651_v29 = vpop.permute.xlu2 %650 }
 0x3f4   : > { %727 = vmatpush.msrb.mxu2 %v688_v18  ;;  %747 = vmatpush.msrb.mxu3 %v689_v19 }
 0x3f6   : > { %728 = vmatpush.msrb.mxu2 %v648_v44  ;;  %748 = vmatpush.msrb.mxu3 %v649_v45 }
 0x3f7   : > { %v677_v24 = vpop.permute.xlu0 %676 }
 0x3f8   : > { %v678_v14 = vsel %vm326_vm4, %v675_v6, %v677_v24  ;;  %v679_v15 = vsel %vm326_vm4, %v677_v24, %v675_v6  ;;  %v667_v16 = vpop.permute.xlu1 %666 }
 0x3f9   : > { %v670_v17 = vsel %vm314_vm5, %v667_v16, %v669_v25  ;;  %v671_v31 = vsel %vm314_vm5, %v669_v25, %v667_v16  ;;  %v680_v32 = vmul.f32 %v1189_v39, %v679_v15  ;;  %v681_v20 = vmul.f32 %v1195_v41, %v678_v14 }
 0x3fa   : > { %v672_v21 = vmul.f32 %v1200_v42, %v671_v31  ;;  %v673_v22 = vmul.f32 %v1205_v43, %v670_v17 }
 0x3fb   : > { %729 = vmatpush.msrb.mxu2 %v680_v32  ;;  %749 = vmatpush.msrb.mxu3 %v681_v20 }
 0x3fd   : > { %730 = vmatpush.msrb.mxu2 %v672_v21  ;;  %750 = vmatpush.msrb.mxu3 %v673_v22 }
 0x3ff   : > { %v659_v23 = vpop.permute.xlu0 %658 }
 0x400   : > { %v661_v26 = vpop.permute.xlu1 %660 }
 0x401   : > { %v662_v27 = vsel %vm302_vm6, %v659_v23, %v661_v26  ;;  %v663_v28 = vsel %vm302_vm6, %v661_v26, %v659_v23 }
 0x402   : > { %v664_v39 = vmul.f32 %v1223_v54, %v663_v28  ;;  %v665_v41 = vmul.f32 %v1228_v55, %v662_v27  ;;  %v950_v54 = vld [vmem:[%s1517_s4 + $0x8] sm:$0xff]  ;;  %v760_v55 = vld [vmem:[%s1519_s6] sm:$0xf] }
 0x403   : > { %763 = vperm.xlu1 %982, %v760_v55  }
 0x404   : > { %731 = vmatpush.msrb.mxu2 %v664_v39  ;;  %751 = vmatpush.msrb.mxu3 %v665_v41 }
 0x407   : > { %v653_v42 = vpop.permute.xlu0 %652 }
 0x408   : > { %v654_v43 = vsel %vm291_vm7, %v651_v29, %v653_v42  ;;  %v655_v2 = vsel %vm291_vm7, %v653_v42, %v651_v29 }
 0x409   : > { %v656_v3 = vmul.f32 %v655_v2, %v1240_v63  ;;  %v657_v34 = vmul.f32 %v654_v43, %v1245_v4 }
 0x40b   : > { %732 = vmatpush.msrb.mxu2 %v656_v3  ;;  %752 = vmatpush.msrb.mxu3 %v657_v34 }
 0x40c   : > { %953 = vmatmul.msk.f32.vlgmr.msrb.gmra.mxu2 %vm382_vm8, %v950_v54  ;;  %954 = vmatmul.msk.f32.vlgmr.msrb.gmra.mxu3 %vm382_vm8, %v950_v54 }
 0x475   : > { %v764_v44 = vpop.permute.xlu1 %763 }
 0x48f   : > { %v734_v63 = vpop.f32.mrf.mxu2  ;;  %v754_v4 = vpop.f32.mrf.mxu3 }
 0x490   : > { %v757_v35 = vadd.f32 %v734_v63, %v1332_v30  ;;  %v758_v36 = vadd.f32 %v754_v4, %v1335_v33 }
 0x492   : > { %v768_v37 = vrot.slane %v757_v35, 4  ;;  %v769_v38 = vrot.slane %v758_v36, 4 }
 0x494   : > { %955 = vmatpush.msk.msra.mxu0 %vm774_vm9, %v768_v37  ;;  %957 = vmatpush.msk.msra.mxu1 %vm774_vm9, %v769_v38 }
 0x495   : > { %956 = vmatmul.msk.f32.vlgmr.msra.gmra.mxu0 %vm770_vm10, %v759_v40  ;;  %958 = vmatmul.msk.f32.vlgmr.msra.gmra.mxu1 %vm770_vm10, %v759_v40 }
 0x512   : > { %v796_v45 = vpop.f32.mrf.mxu0  ;;  %v816_v46 = vpop.f32.mrf.mxu1 }
 0x513   : > { %v797_v30 = vadd.f32 %v796_v45, %v764_v44  ;;  %v817_v47 = vadd.f32 %v816_v46, %v764_v44 }
 0x515   : > { %v959_v33 = vmul.f32 -1.442695, %v797_v30  ;;  %v960_v48 = vmul.f32 -1.442695, %v817_v47 }
 0x517   : > { %984 = vpow2.f32 %v959_v33 }
 0x518   : > { %986 = vpow2.f32 %v960_v48 }
 0x51d   : > { %v985_v49 = vpop.eup %984 }
 0x51e   : > { %v987_v50 = vpop.eup %986  ;;  %v825_v51 = vadd.f32 1.0, %v985_v49 }
 0x51f   : > { %v826_v52 = vadd.f32 1.0, %v987_v50 }
 0x520   : > { %988 = vrcp.f32 %v825_v51  ;;  %v838_v60 = vand.u32 2147483648, %v825_v51  ;;  %v836_v11 = vand.u32 2147483647, %v825_v51  ;;  %vm832_vm13 = vweird.f32 %v825_v51 }
 0x521   : > { %990 = vrcp.f32 %v826_v52  ;;  %v853_v62 = vand.u32 2147483648, %v826_v52  ;;  %v851_v6 = vand.u32 2147483647, %v826_v52  ;;  %vm847_vm15 = vweird.f32 %v826_v52 }
 0x522   : > { %v839_v9 = vor.u32 1.1754944e-38, %v838_v60  ;;  %vm837_vm0 = vcmp.eq.f32.partialorder %v836_v11, 8.507059e+37 }
 0x523   : > { %v854_v18 = vor.u32 1.1754944e-38, %v853_v62  ;;  %vm852_vm2 = vcmp.eq.f32.partialorder %v851_v6, 8.507059e+37 }
 0x526   : > { %v989_v53 = vpop.eup %988 }
 0x527   : > { %v991_v56 = vpop.eup %990  ;;  %v828_v57 = vmul.f32 %v989_v53, %v825_v51  ;;  %vm833_vm11 = vweird.f32 %v989_v53 }
 0x528   : > { %v843_v58 = vmul.f32 %v991_v56, %v826_v52  ;;  %vm848_vm12 = vweird.f32 %v991_v56  ;;  %vm834_vm14 = vmor %vm832_vm13, %vm833_vm11 }
 0x529   : > { %v829_v59 = vsub.f32 1.0, %v828_v57  ;;  %vm849_vm1 = vmor %vm847_vm15, %vm848_vm12 }
 0x52a   : > { %v844_v61 = vsub.f32 1.0, %v843_v58 }
 0x52b   : > { %v830_v10 = vmul.f32 %v989_v53, %v829_v59 }
 0x52c   : > { %v845_v5 = vmul.f32 %v991_v56, %v844_v61 }
 0x52d   : > { %v831_v7 = vadd.f32 %v989_v53, %v830_v10 }
 0x52e   : > { %v846_v12 = vadd.f32 %v991_v56, %v845_v5 }
 0x52f   : > { %v835_v13 = vsel %vm834_vm14, %v989_v53, %v831_v7 }
 0x530   : > { %v840_v19 = vsel %vm837_vm0, %v839_v9, %v835_v13  ;;  %v850_v24 = vsel %vm849_vm1, %v991_v56, %v846_v12 }
 0x531   : > { %v855_v25 = vsel %vm852_vm2, %v854_v18, %v850_v24  ;;  %v857_v14 = vmul.f32 %v840_v19, %v757_v35 }
 0x532   : > { %v858_v15 = vmul.f32 %v855_v25, %v758_v36 }
 0x533   : > { %v859_v17 = vadd.f32 %v857_v14, %v1063_v0 }
 0x534   : > { %v860_v16 = vadd.f32 %v858_v15, %v1071_v1 }
 0x536   : > { %v863_v31 = vrot.slane %v860_v16, 4 }
 0x538   : > { %v864_v32 = vsel %vm774_vm9, %v859_v17, %v863_v31 }
 0x539   : > { %866 = vst [vmem:[%s278_s19] sm:$0xff] %v864_v32 }
 0x53a PF: > { %s17_s24 = sadd.s32 1, %s998_s24  }
 0x53b   : > { %p14_p4 = scmp.ge.s32.totalorder %s17_s24, 4  }
 0x53d   :  { %16 = sbr.rel (!%p14_p4) target bundleno = 1 (0x1), region = 87 }

</bundles_post_ra>
